<compile_context>
chip_gen: v7x
topology: tpu7x:2x2x1
jax: 0.10.0
libtpu: 0.0.40
codegen_flags: <defaults>
</compile_context>

<pallas_src>
import functools

import jax
import jax.numpy as jnp
from jax.experimental import pallas as pl
from jax.experimental.pallas import tpu as pltpu


def _raw_encoder_kernel(ids_ref, table_hbm, pe_ref, wq_ref, bq_ref, out_ref,
                        gather_buf, gather_sems, *, unroll):
    # ids_ref:     (seq_pad,)      int32  (SMEM, scalar-prefetched)
    # table_hbm:   (vocab, emb)    f32    (HBM, no auto-DMA)
    # pe_ref:      (tseq, emb)     f32    (VMEM tile)
    # wq_ref:      (emb, dpad)     f32    (VMEM, padded W_q^T)
    # bq_ref:      (1, dpad)       f32
    # out_ref:     (tseq, dpad)    f32
    # gather_buf:  (tseq, emb)     f32    VMEM scratch for gathered rows
    # gather_sems: (tseq,)         DMA semaphores (one per row DMA)
    tseq, _ = gather_buf.shape
    base = pl.program_id(0) * tseq

    # Issue all row-gather DMAs (scalar ids read from SMEM feed the addresses).
    @pl.loop(0, tseq, unroll=unroll)
    def _start(r):
        tok = ids_ref[base + r]
        pltpu.make_async_copy(
            table_hbm.at[pl.ds(tok, 1)],
            gather_buf.at[pl.ds(r, 1)],
            gather_sems.at[r],
        ).start()

    # Wait for all row DMAs to land.
    @pl.loop(0, tseq, unroll=unroll)
    def _wait(r):
        pltpu.make_async_copy(
            table_hbm.at[pl.ds(0, 1)],
            gather_buf.at[pl.ds(r, 1)],
            gather_sems.at[r],
        ).wait()

    x = gather_buf[...] + pe_ref[...]                               # (tseq, emb)
    y = jnp.dot(x, wq_ref[...], preferred_element_type=jnp.float32) # (tseq, dpad)
    out_ref[...] = (y + bq_ref[...]).astype(out_ref.dtype)


def _positional_encoding(max_seq_len, embedding_size):
    # torch.range is end-inclusive -> [1 .. N]
    seq_range = jnp.arange(1, max_seq_len + 1, dtype=jnp.float32).reshape(-1, 1)
    pos_range = jnp.arange(1, embedding_size + 1, dtype=jnp.float32)
    pe = seq_range / jnp.power(10000.0, 2.0 * pos_range / embedding_size)
    even = jnp.sin(pe[:, 0::2])
    odd = jnp.cos(pe[:, 1::2])
    pe = pe.at[:, 0::2].set(even)
    pe = pe.at[:, 1::2].set(odd)
    return pe  # (max_seq_len, embedding_size) f32


def prepare_weights(weights, params):
    """One-time weight prep: transpose W_q and zero-pad its output dim to a
    multiple of 128 so the kernel's output stores are lane-dense."""
    emb = params['embedding_size']
    dout = emb // params['num_att_heads']
    dpad = max(128, ((dout + 127) // 128) * 128)

    wq_t_pad = jnp.zeros((emb, dpad), jnp.float32)
    wq_t_pad = wq_t_pad.at[:, :dout].set(weights['att_q_w'].T.astype(jnp.float32))
    bq_pad = jnp.zeros((1, dpad), jnp.float32)
    bq_pad = bq_pad.at[:, :dout].set(weights['att_q_b'].astype(jnp.float32))

    return {
        'embedding': weights['embedding'].astype(jnp.float32),
        'pe': weights['pe'].astype(jnp.float32),
        'wq_t_pad': wq_t_pad,
        'bq_pad': bq_pad,
        'dout': dout,
        'dpad': dpad,
    }


def _choose_seq_tile(seq):
    # Largest power-of-two tile (<=512 rows) not exceeding the sequence; big
    # tiles keep the pipeline near the HBM roofline, small per-step overhead.
    for t in (512, 256, 128, 64, 32, 16, 8):
        if seq >= t:
            return t
    return 8


def raw_encoder_forward(inputs, input_type, prep, params):
    """inputs: (seq,) int32 token ids."""
    if input_type != 'query':
        # PyTorch forward returns the untouched `inputs` in this branch.
        return inputs

    seq = int(inputs.shape[0])
    emb = params['embedding_size']
    vocab = params['vocab_size']
    dout = prep['dout']
    dpad = prep['dpad']

    tseq = _choose_seq_tile(seq)
    num_tiles = pl.cdiv(seq, tseq)
    seq_pad = num_tiles * tseq

    # Clamp ids (DMA gather has no useful runtime bounds check) and pad the
    # sequence up to a tile multiple; padded rows are sliced off below.
    ids = jnp.clip(inputs.astype(jnp.int32), 0, vocab - 1)
    pe = prep['pe'][:seq]
    if seq_pad != seq:
        ids = jnp.pad(ids, (0, seq_pad - seq))
        pe = jnp.pad(pe, ((0, seq_pad - seq), (0, 0)))

    kernel = functools.partial(_raw_encoder_kernel, unroll=bool(tseq <= 32))

    # VMEM budget: double-buffered pe/out/wq/bias tiles + gather scratch.
    tile_bytes = 4 * (2 * tseq * emb + 2 * tseq * dpad + 2 * emb * dpad
                      + 2 * dpad + tseq * emb)
    vmem_limit = int(min(max(2 * tile_bytes, 16 * 1024 * 1024),
                         48 * 1024 * 1024))

    flops = 2 * seq_pad * emb * dpad + seq_pad * emb
    bytes_accessed = 4 * (seq_pad * emb       # gathered embedding rows
                          + seq_pad * emb     # positional encoding
                          + emb * dpad + dpad  # weights + bias
                          + seq_pad * dpad    # output
                          + seq_pad)          # token ids

    out_padded = pl.pallas_call(
        kernel,
        out_shape=jax.ShapeDtypeStruct((seq_pad, dpad), jnp.float32),
        grid_spec=pltpu.PrefetchScalarGridSpec(
            num_scalar_prefetch=1,
            grid=(num_tiles,),
            in_specs=[
                pl.BlockSpec(memory_space=pl.ANY),                       # table (HBM)
                pl.BlockSpec((tseq, emb), lambda i, ids_pref: (i, 0)),   # pe tile
                pl.BlockSpec((emb, dpad), lambda i, ids_pref: (0, 0)),   # W_q^T (padded)
                pl.BlockSpec((1, dpad), lambda i, ids_pref: (0, 0)),     # bias (padded)
            ],
            out_specs=pl.BlockSpec((tseq, dpad), lambda i, ids_pref: (i, 0)),
            scratch_shapes=[
                pltpu.VMEM((tseq, emb), jnp.float32),
                pltpu.SemaphoreType.DMA((tseq,)),
            ],
        ),
        compiler_params=pltpu.CompilerParams(
            dimension_semantics=("parallel",),
            vmem_limit_bytes=vmem_limit,
        ),
        cost_estimate=pl.CostEstimate(flops=flops, transcendentals=0,
                                      bytes_accessed=bytes_accessed),
    )(ids, prep['embedding'], pe, prep['wq_t_pad'], prep['bq_pad'])

    return out_padded[:seq, :dout]


def _reference_forward(inputs, weights, params):
    # Pure-JAX reference for correctness check.
    seq = inputs.shape[0]
    embd = weights['embedding'][inputs]
    embd = embd + weights['pe'][:seq]
    return embd @ weights['att_q_w'].T + weights['att_q_b']


if __name__ == "__main__":
    params = {
        'vocab_size': 64,
        'embedding_size': 32,
        'num_att_heads': 4,
        'max_seq_len': 16,
    }
    seq_len = 8
    dout = params['embedding_size'] // params['num_att_heads']

    key = jax.random.PRNGKey(0)
    k_emb, k_w, k_b, k_ids, k_ids2 = jax.random.split(key, 5)

    weights = {
        'embedding': jax.random.normal(
            k_emb, (params['vocab_size'], params['embedding_size']), jnp.float32),
        'att_q_w': jax.random.normal(
            k_w, (dout, params['embedding_size']), jnp.float32) * 0.1,
        'att_q_b': jax.random.normal(k_b, (dout,), jnp.float32) * 0.1,
        'pe': _positional_encoding(params['max_seq_len'], params['embedding_size']),
    }
    prep = prepare_weights(weights, params)

    # --- query branch, seq that exactly fills one tile ---
    token_ids = jax.random.randint(k_ids, (seq_len,), 0, params['vocab_size'],
                                   dtype=jnp.int32)
    out = raw_encoder_forward(token_ids, 'query', prep, params)
    out = jax.block_until_ready(out)
    ref = _reference_forward(token_ids, weights, params)
    assert out.shape == (seq_len, dout)
    assert jnp.allclose(out, ref, atol=1e-5, rtol=1e-5)

    # --- query branch, ragged seq (exercises seq-tile padding path) ---
    token_ids2 = jax.random.randint(k_ids2, (13,), 0, params['vocab_size'],
                                    dtype=jnp.int32)
    out2 = jax.block_until_ready(
        raw_encoder_forward(token_ids2, 'query', prep, params))
    ref2 = _reference_forward(token_ids2, weights, params)
    assert out2.shape == (13, dout)
    assert jnp.allclose(out2, ref2, atol=1e-5, rtol=1e-5)

    # --- non-query branch returns the raw inputs unchanged (no kernel) ---
    passthrough = raw_encoder_forward(token_ids, 'document', prep, params)
    assert jnp.array_equal(passthrough, token_ids)

    print("KERNEL_OK")
</pallas_src>

<mosaic_0001>
module attributes {stable_mosaic.version = 11 : i64} {
  func.func @_raw_encoder_kernel(%arg0: i32, %arg1: memref<8xi32, #tpu.memory_space<smem>>, %arg2: memref<64x32xf32, #tpu.memory_space<any>>, %arg3: memref<8x32xf32, #tpu.memory_space<vmem>>, %arg4: memref<32x128xf32, #tpu.memory_space<vmem>>, %arg5: memref<1x128xf32, #tpu.memory_space<vmem>>, %arg6: memref<8x128xf32, #tpu.memory_space<vmem>>, %arg7: memref<8x32xf32, #tpu.memory_space<vmem>>, %arg8: memref<8x!tpu.dma_semaphore, #tpu.memory_space<semaphore_mem>>) attributes {dimension_semantics = [#tpu.dimension_semantics<parallel>], iteration_bounds = array<i64: 1>, scalar_prefetch = 1 : i64, scratch_operands = 2 : i64, tpu.core_type = #tpu.core_type<tc>, window_params = [{}, {transform_indices = @transform_1, window_bounds = array<i64: 8, 32>}, {pipeline_mode = #tpu.pipeline_mode<synchronous>, transform_indices = @transform_2, window_bounds = array<i64: 32, 128>}, {pipeline_mode = #tpu.pipeline_mode<synchronous>, transform_indices = @transform_3, window_bounds = array<i64: 1, 128>}, {transform_indices = @transform_4, window_bounds = array<i64: 8, 128>}]} {
    %c8_i32 = arith.constant 8 : i32
    %0 = arith.muli %arg0, %c8_i32 : i32
    %c0_i32 = arith.constant 0 : i32
    %c1_i32 = arith.constant 1 : i32
    %1 = arith.muli %c0_i32, %c1_i32 : i32
    %c0_i32_0 = arith.constant 0 : i32
    %2 = arith.addi %c0_i32_0, %1 : i32
    %3 = arith.addi %0, %2 : i32
    %4 = arith.index_cast %3 : i32 to index
    %5 = memref.load %arg1[%4] : memref<8xi32, #tpu.memory_space<smem>>
    %c0_i32_1 = arith.constant 0 : i32
    %6 = tpu.memref_slice %arg2[%5, %c0_i32_1] : memref<64x32xf32, #tpu.memory_space<any>> -> memref<1x32xf32, #tpu.memory_space<any>>
    %c0_i32_2 = arith.constant 0 : i32
    %7 = tpu.memref_slice %arg7[%2, %c0_i32_2] : memref<8x32xf32, #tpu.memory_space<vmem>> -> memref<1x32xf32, #tpu.memory_space<vmem>>
    %8 = tpu.memref_slice %arg8[%2] : memref<8x!tpu.dma_semaphore, #tpu.memory_space<semaphore_mem>> -> memref<1x!tpu.dma_semaphore, #tpu.memory_space<semaphore_mem>>
    %9 = tpu.memref_squeeze %8 : memref<1x!tpu.dma_semaphore, #tpu.memory_space<semaphore_mem>> -> memref<!tpu.dma_semaphore, #tpu.memory_space<semaphore_mem>>
    tpu.enqueue_dma source(%6 : memref<1x32xf32, #tpu.memory_space<any>>) target(%7 : memref<1x32xf32, #tpu.memory_space<vmem>>) target_semaphore(%9 : memref<!tpu.dma_semaphore, #tpu.memory_space<semaphore_mem>>)
    %c1_i32_3 = arith.constant 1 : i32
    %c1_i32_4 = arith.constant 1 : i32
    %10 = arith.muli %c1_i32_3, %c1_i32_4 : i32
    %c0_i32_5 = arith.constant 0 : i32
    %11 = arith.addi %c0_i32_5, %10 : i32
    %12 = arith.addi %0, %11 : i32
    %13 = arith.index_cast %12 : i32 to index
    %14 = memref.load %arg1[%13] : memref<8xi32, #tpu.memory_space<smem>>
    %c0_i32_6 = arith.constant 0 : i32
    %15 = tpu.memref_slice %arg2[%14, %c0_i32_6] : memref<64x32xf32, #tpu.memory_space<any>> -> memref<1x32xf32, #tpu.memory_space<any>>
    %c0_i32_7 = arith.constant 0 : i32
    %16 = tpu.memref_slice %arg7[%11, %c0_i32_7] : memref<8x32xf32, #tpu.memory_space<vmem>> -> memref<1x32xf32, #tpu.memory_space<vmem>>
    %17 = tpu.memref_slice %arg8[%11] : memref<8x!tpu.dma_semaphore, #tpu.memory_space<semaphore_mem>> -> memref<1x!tpu.dma_semaphore, #tpu.memory_space<semaphore_mem>>
    %18 = tpu.memref_squeeze %17 : memref<1x!tpu.dma_semaphore, #tpu.memory_space<semaphore_mem>> -> memref<!tpu.dma_semaphore, #tpu.memory_space<semaphore_mem>>
    tpu.enqueue_dma source(%15 : memref<1x32xf32, #tpu.memory_space<any>>) target(%16 : memref<1x32xf32, #tpu.memory_space<vmem>>) target_semaphore(%18 : memref<!tpu.dma_semaphore, #tpu.memory_space<semaphore_mem>>)
    %c2_i32 = arith.constant 2 : i32
    %c1_i32_8 = arith.constant 1 : i32
    %19 = arith.muli %c2_i32, %c1_i32_8 : i32
    %c0_i32_9 = arith.constant 0 : i32
    %20 = arith.addi %c0_i32_9, %19 : i32
    %21 = arith.addi %0, %20 : i32
    %22 = arith.index_cast %21 : i32 to index
    %23 = memref.load %arg1[%22] : memref<8xi32, #tpu.memory_space<smem>>
    %c0_i32_10 = arith.constant 0 : i32
    %24 = tpu.memref_slice %arg2[%23, %c0_i32_10] : memref<64x32xf32, #tpu.memory_space<any>> -> memref<1x32xf32, #tpu.memory_space<any>>
    %c0_i32_11 = arith.constant 0 : i32
    %25 = tpu.memref_slice %arg7[%20, %c0_i32_11] : memref<8x32xf32, #tpu.memory_space<vmem>> -> memref<1x32xf32, #tpu.memory_space<vmem>>
    %26 = tpu.memref_slice %arg8[%20] : memref<8x!tpu.dma_semaphore, #tpu.memory_space<semaphore_mem>> -> memref<1x!tpu.dma_semaphore, #tpu.memory_space<semaphore_mem>>
    %27 = tpu.memref_squeeze %26 : memref<1x!tpu.dma_semaphore, #tpu.memory_space<semaphore_mem>> -> memref<!tpu.dma_semaphore, #tpu.memory_space<semaphore_mem>>
    tpu.enqueue_dma source(%24 : memref<1x32xf32, #tpu.memory_space<any>>) target(%25 : memref<1x32xf32, #tpu.memory_space<vmem>>) target_semaphore(%27 : memref<!tpu.dma_semaphore, #tpu.memory_space<semaphore_mem>>)
    %c3_i32 = arith.constant 3 : i32
    %c1_i32_12 = arith.constant 1 : i32
    %28 = arith.muli %c3_i32, %c1_i32_12 : i32
    %c0_i32_13 = arith.constant 0 : i32
    %29 = arith.addi %c0_i32_13, %28 : i32
    %30 = arith.addi %0, %29 : i32
    %31 = arith.index_cast %30 : i32 to index
    %32 = memref.load %arg1[%31] : memref<8xi32, #tpu.memory_space<smem>>
    %c0_i32_14 = arith.constant 0 : i32
    %33 = tpu.memref_slice %arg2[%32, %c0_i32_14] : memref<64x32xf32, #tpu.memory_space<any>> -> memref<1x32xf32, #tpu.memory_space<any>>
    %c0_i32_15 = arith.constant 0 : i32
    %34 = tpu.memref_slice %arg7[%29, %c0_i32_15] : memref<8x32xf32, #tpu.memory_space<vmem>> -> memref<1x32xf32, #tpu.memory_space<vmem>>
    %35 = tpu.memref_slice %arg8[%29] : memref<8x!tpu.dma_semaphore, #tpu.memory_space<semaphore_mem>> -> memref<1x!tpu.dma_semaphore, #tpu.memory_space<semaphore_mem>>
    %36 = tpu.memref_squeeze %35 : memref<1x!tpu.dma_semaphore, #tpu.memory_space<semaphore_mem>> -> memref<!tpu.dma_semaphore, #tpu.memory_space<semaphore_mem>>
    tpu.enqueue_dma source(%33 : memref<1x32xf32, #tpu.memory_space<any>>) target(%34 : memref<1x32xf32, #tpu.memory_space<vmem>>) target_semaphore(%36 : memref<!tpu.dma_semaphore, #tpu.memory_space<semaphore_mem>>)
    %c4_i32 = arith.constant 4 : i32
    %c1_i32_16 = arith.constant 1 : i32
    %37 = arith.muli %c4_i32, %c1_i32_16 : i32
    %c0_i32_17 = arith.constant 0 : i32
    %38 = arith.addi %c0_i32_17, %37 : i32
    %39 = arith.addi %0, %38 : i32
    %40 = arith.index_cast %39 : i32 to index
    %41 = memref.load %arg1[%40] : memref<8xi32, #tpu.memory_space<smem>>
    %c0_i32_18 = arith.constant 0 : i32
    %42 = tpu.memref_slice %arg2[%41, %c0_i32_18] : memref<64x32xf32, #tpu.memory_space<any>> -> memref<1x32xf32, #tpu.memory_space<any>>
    %c0_i32_19 = arith.constant 0 : i32
    %43 = tpu.memref_slice %arg7[%38, %c0_i32_19] : memref<8x32xf32, #tpu.memory_space<vmem>> -> memref<1x32xf32, #tpu.memory_space<vmem>>
    %44 = tpu.memref_slice %arg8[%38] : memref<8x!tpu.dma_semaphore, #tpu.memory_space<semaphore_mem>> -> memref<1x!tpu.dma_semaphore, #tpu.memory_space<semaphore_mem>>
    %45 = tpu.memref_squeeze %44 : memref<1x!tpu.dma_semaphore, #tpu.memory_space<semaphore_mem>> -> memref<!tpu.dma_semaphore, #tpu.memory_space<semaphore_mem>>
    tpu.enqueue_dma source(%42 : memref<1x32xf32, #tpu.memory_space<any>>) target(%43 : memref<1x32xf32, #tpu.memory_space<vmem>>) target_semaphore(%45 : memref<!tpu.dma_semaphore, #tpu.memory_space<semaphore_mem>>)
    %c5_i32 = arith.constant 5 : i32
    %c1_i32_20 = arith.constant 1 : i32
    %46 = arith.muli %c5_i32, %c1_i32_20 : i32
    %c0_i32_21 = arith.constant 0 : i32
    %47 = arith.addi %c0_i32_21, %46 : i32
    %48 = arith.addi %0, %47 : i32
    %49 = arith.index_cast %48 : i32 to index
    %50 = memref.load %arg1[%49] : memref<8xi32, #tpu.memory_space<smem>>
    %c0_i32_22 = arith.constant 0 : i32
    %51 = tpu.memref_slice %arg2[%50, %c0_i32_22] : memref<64x32xf32, #tpu.memory_space<any>> -> memref<1x32xf32, #tpu.memory_space<any>>
    %c0_i32_23 = arith.constant 0 : i32
    %52 = tpu.memref_slice %arg7[%47, %c0_i32_23] : memref<8x32xf32, #tpu.memory_space<vmem>> -> memref<1x32xf32, #tpu.memory_space<vmem>>
    %53 = tpu.memref_slice %arg8[%47] : memref<8x!tpu.dma_semaphore, #tpu.memory_space<semaphore_mem>> -> memref<1x!tpu.dma_semaphore, #tpu.memory_space<semaphore_mem>>
    %54 = tpu.memref_squeeze %53 : memref<1x!tpu.dma_semaphore, #tpu.memory_space<semaphore_mem>> -> memref<!tpu.dma_semaphore, #tpu.memory_space<semaphore_mem>>
    tpu.enqueue_dma source(%51 : memref<1x32xf32, #tpu.memory_space<any>>) target(%52 : memref<1x32xf32, #tpu.memory_space<vmem>>) target_semaphore(%54 : memref<!tpu.dma_semaphore, #tpu.memory_space<semaphore_mem>>)
    %c6_i32 = arith.constant 6 : i32
    %c1_i32_24 = arith.constant 1 : i32
    %55 = arith.muli %c6_i32, %c1_i32_24 : i32
    %c0_i32_25 = arith.constant 0 : i32
    %56 = arith.addi %c0_i32_25, %55 : i32
    %57 = arith.addi %0, %56 : i32
    %58 = arith.index_cast %57 : i32 to index
    %59 = memref.load %arg1[%58] : memref<8xi32, #tpu.memory_space<smem>>
    %c0_i32_26 = arith.constant 0 : i32
    %60 = tpu.memref_slice %arg2[%59, %c0_i32_26] : memref<64x32xf32, #tpu.memory_space<any>> -> memref<1x32xf32, #tpu.memory_space<any>>
    %c0_i32_27 = arith.constant 0 : i32
    %61 = tpu.memref_slice %arg7[%56, %c0_i32_27] : memref<8x32xf32, #tpu.memory_space<vmem>> -> memref<1x32xf32, #tpu.memory_space<vmem>>
    %62 = tpu.memref_slice %arg8[%56] : memref<8x!tpu.dma_semaphore, #tpu.memory_space<semaphore_mem>> -> memref<1x!tpu.dma_semaphore, #tpu.memory_space<semaphore_mem>>
    %63 = tpu.memref_squeeze %62 : memref<1x!tpu.dma_semaphore, #tpu.memory_space<semaphore_mem>> -> memref<!tpu.dma_semaphore, #tpu.memory_space<semaphore_mem>>
    tpu.enqueue_dma source(%60 : memref<1x32xf32, #tpu.memory_space<any>>) target(%61 : memref<1x32xf32, #tpu.memory_space<vmem>>) target_semaphore(%63 : memref<!tpu.dma_semaphore, #tpu.memory_space<semaphore_mem>>)
    %c7_i32 = arith.constant 7 : i32
    %c1_i32_28 = arith.constant 1 : i32
    %64 = arith.muli %c7_i32, %c1_i32_28 : i32
    %c0_i32_29 = arith.constant 0 : i32
    %65 = arith.addi %c0_i32_29, %64 : i32
    %66 = arith.addi %0, %65 : i32
    %67 = arith.index_cast %66 : i32 to index
    %68 = memref.load %arg1[%67] : memref<8xi32, #tpu.memory_space<smem>>
    %c0_i32_30 = arith.constant 0 : i32
    %69 = tpu.memref_slice %arg2[%68, %c0_i32_30] : memref<64x32xf32, #tpu.memory_space<any>> -> memref<1x32xf32, #tpu.memory_space<any>>
    %c0_i32_31 = arith.constant 0 : i32
    %70 = tpu.memref_slice %arg7[%65, %c0_i32_31] : memref<8x32xf32, #tpu.memory_space<vmem>> -> memref<1x32xf32, #tpu.memory_space<vmem>>
    %71 = tpu.memref_slice %arg8[%65] : memref<8x!tpu.dma_semaphore, #tpu.memory_space<semaphore_mem>> -> memref<1x!tpu.dma_semaphore, #tpu.memory_space<semaphore_mem>>
    %72 = tpu.memref_squeeze %71 : memref<1x!tpu.dma_semaphore, #tpu.memory_space<semaphore_mem>> -> memref<!tpu.dma_semaphore, #tpu.memory_space<semaphore_mem>>
    tpu.enqueue_dma source(%69 : memref<1x32xf32, #tpu.memory_space<any>>) target(%70 : memref<1x32xf32, #tpu.memory_space<vmem>>) target_semaphore(%72 : memref<!tpu.dma_semaphore, #tpu.memory_space<semaphore_mem>>)
    %c8_i32_32 = arith.constant 8 : i32
    %c0_i32_33 = arith.constant 0 : i32
    %c1_i32_34 = arith.constant 1 : i32
    %73 = arith.muli %c0_i32_33, %c1_i32_34 : i32
    %c0_i32_35 = arith.constant 0 : i32
    %74 = arith.addi %c0_i32_35, %73 : i32
    %c0_i32_36 = arith.constant 0 : i32
    %c0_i32_37 = arith.constant 0 : i32
    %75 = tpu.memref_slice %arg2[%c0_i32_36, %c0_i32_37] : memref<64x32xf32, #tpu.memory_space<any>> -> memref<1x32xf32, #tpu.memory_space<any>>
    %c0_i32_38 = arith.constant 0 : i32
    %76 = tpu.memref_slice %arg7[%74, %c0_i32_38] : memref<8x32xf32, #tpu.memory_space<vmem>> -> memref<1x32xf32, #tpu.memory_space<vmem>>
    %77 = tpu.memref_slice %arg8[%74] : memref<8x!tpu.dma_semaphore, #tpu.memory_space<semaphore_mem>> -> memref<1x!tpu.dma_semaphore, #tpu.memory_space<semaphore_mem>>
    %78 = tpu.memref_squeeze %77 : memref<1x!tpu.dma_semaphore, #tpu.memory_space<semaphore_mem>> -> memref<!tpu.dma_semaphore, #tpu.memory_space<semaphore_mem>>
    tpu.wait_dma2 semaphore(%78 : memref<!tpu.dma_semaphore, #tpu.memory_space<semaphore_mem>>) src(%75 : memref<1x32xf32, #tpu.memory_space<any>>) dst(%76 : memref<1x32xf32, #tpu.memory_space<vmem>>)
    %c1_i32_39 = arith.constant 1 : i32
    %c1_i32_40 = arith.constant 1 : i32
    %79 = arith.muli %c1_i32_39, %c1_i32_40 : i32
    %c0_i32_41 = arith.constant 0 : i32
    %80 = arith.addi %c0_i32_41, %79 : i32
    %c0_i32_42 = arith.constant 0 : i32
    %c0_i32_43 = arith.constant 0 : i32
    %81 = tpu.memref_slice %arg2[%c0_i32_42, %c0_i32_43] : memref<64x32xf32, #tpu.memory_space<any>> -> memref<1x32xf32, #tpu.memory_space<any>>
    %c0_i32_44 = arith.constant 0 : i32
    %82 = tpu.memref_slice %arg7[%80, %c0_i32_44] : memref<8x32xf32, #tpu.memory_space<vmem>> -> memref<1x32xf32, #tpu.memory_space<vmem>>
    %83 = tpu.memref_slice %arg8[%80] : memref<8x!tpu.dma_semaphore, #tpu.memory_space<semaphore_mem>> -> memref<1x!tpu.dma_semaphore, #tpu.memory_space<semaphore_mem>>
    %84 = tpu.memref_squeeze %83 : memref<1x!tpu.dma_semaphore, #tpu.memory_space<semaphore_mem>> -> memref<!tpu.dma_semaphore, #tpu.memory_space<semaphore_mem>>
    tpu.wait_dma2 semaphore(%84 : memref<!tpu.dma_semaphore, #tpu.memory_space<semaphore_mem>>) src(%81 : memref<1x32xf32, #tpu.memory_space<any>>) dst(%82 : memref<1x32xf32, #tpu.memory_space<vmem>>)
    %c2_i32_45 = arith.constant 2 : i32
    %c1_i32_46 = arith.constant 1 : i32
    %85 = arith.muli %c2_i32_45, %c1_i32_46 : i32
    %c0_i32_47 = arith.constant 0 : i32
    %86 = arith.addi %c0_i32_47, %85 : i32
    %c0_i32_48 = arith.constant 0 : i32
    %c0_i32_49 = arith.constant 0 : i32
    %87 = tpu.memref_slice %arg2[%c0_i32_48, %c0_i32_49] : memref<64x32xf32, #tpu.memory_space<any>> -> memref<1x32xf32, #tpu.memory_space<any>>
    %c0_i32_50 = arith.constant 0 : i32
    %88 = tpu.memref_slice %arg7[%86, %c0_i32_50] : memref<8x32xf32, #tpu.memory_space<vmem>> -> memref<1x32xf32, #tpu.memory_space<vmem>>
    %89 = tpu.memref_slice %arg8[%86] : memref<8x!tpu.dma_semaphore, #tpu.memory_space<semaphore_mem>> -> memref<1x!tpu.dma_semaphore, #tpu.memory_space<semaphore_mem>>
    %90 = tpu.memref_squeeze %89 : memref<1x!tpu.dma_semaphore, #tpu.memory_space<semaphore_mem>> -> memref<!tpu.dma_semaphore, #tpu.memory_space<semaphore_mem>>
    tpu.wait_dma2 semaphore(%90 : memref<!tpu.dma_semaphore, #tpu.memory_space<semaphore_mem>>) src(%87 : memref<1x32xf32, #tpu.memory_space<any>>) dst(%88 : memref<1x32xf32, #tpu.memory_space<vmem>>)
    %c3_i32_51 = arith.constant 3 : i32
    %c1_i32_52 = arith.constant 1 : i32
    %91 = arith.muli %c3_i32_51, %c1_i32_52 : i32
    %c0_i32_53 = arith.constant 0 : i32
    %92 = arith.addi %c0_i32_53, %91 : i32
    %c0_i32_54 = arith.constant 0 : i32
    %c0_i32_55 = arith.constant 0 : i32
    %93 = tpu.memref_slice %arg2[%c0_i32_54, %c0_i32_55] : memref<64x32xf32, #tpu.memory_space<any>> -> memref<1x32xf32, #tpu.memory_space<any>>
    %c0_i32_56 = arith.constant 0 : i32
    %94 = tpu.memref_slice %arg7[%92, %c0_i32_56] : memref<8x32xf32, #tpu.memory_space<vmem>> -> memref<1x32xf32, #tpu.memory_space<vmem>>
    %95 = tpu.memref_slice %arg8[%92] : memref<8x!tpu.dma_semaphore, #tpu.memory_space<semaphore_mem>> -> memref<1x!tpu.dma_semaphore, #tpu.memory_space<semaphore_mem>>
    %96 = tpu.memref_squeeze %95 : memref<1x!tpu.dma_semaphore, #tpu.memory_space<semaphore_mem>> -> memref<!tpu.dma_semaphore, #tpu.memory_space<semaphore_mem>>
    tpu.wait_dma2 semaphore(%96 : memref<!tpu.dma_semaphore, #tpu.memory_space<semaphore_mem>>) src(%93 : memref<1x32xf32, #tpu.memory_space<any>>) dst(%94 : memref<1x32xf32, #tpu.memory_space<vmem>>)
    %c4_i32_57 = arith.constant 4 : i32
    %c1_i32_58 = arith.constant 1 : i32
    %97 = arith.muli %c4_i32_57, %c1_i32_58 : i32
    %c0_i32_59 = arith.constant 0 : i32
    %98 = arith.addi %c0_i32_59, %97 : i32
    %c0_i32_60 = arith.constant 0 : i32
    %c0_i32_61 = arith.constant 0 : i32
    %99 = tpu.memref_slice %arg2[%c0_i32_60, %c0_i32_61] : memref<64x32xf32, #tpu.memory_space<any>> -> memref<1x32xf32, #tpu.memory_space<any>>
    %c0_i32_62 = arith.constant 0 : i32
    %100 = tpu.memref_slice %arg7[%98, %c0_i32_62] : memref<8x32xf32, #tpu.memory_space<vmem>> -> memref<1x32xf32, #tpu.memory_space<vmem>>
    %101 = tpu.memref_slice %arg8[%98] : memref<8x!tpu.dma_semaphore, #tpu.memory_space<semaphore_mem>> -> memref<1x!tpu.dma_semaphore, #tpu.memory_space<semaphore_mem>>
    %102 = tpu.memref_squeeze %101 : memref<1x!tpu.dma_semaphore, #tpu.memory_space<semaphore_mem>> -> memref<!tpu.dma_semaphore, #tpu.memory_space<semaphore_mem>>
    tpu.wait_dma2 semaphore(%102 : memref<!tpu.dma_semaphore, #tpu.memory_space<semaphore_mem>>) src(%99 : memref<1x32xf32, #tpu.memory_space<any>>) dst(%100 : memref<1x32xf32, #tpu.memory_space<vmem>>)
    %c5_i32_63 = arith.constant 5 : i32
    %c1_i32_64 = arith.constant 1 : i32
    %103 = arith.muli %c5_i32_63, %c1_i32_64 : i32
    %c0_i32_65 = arith.constant 0 : i32
    %104 = arith.addi %c0_i32_65, %103 : i32
    %c0_i32_66 = arith.constant 0 : i32
    %c0_i32_67 = arith.constant 0 : i32
    %105 = tpu.memref_slice %arg2[%c0_i32_66, %c0_i32_67] : memref<64x32xf32, #tpu.memory_space<any>> -> memref<1x32xf32, #tpu.memory_space<any>>
    %c0_i32_68 = arith.constant 0 : i32
    %106 = tpu.memref_slice %arg7[%104, %c0_i32_68] : memref<8x32xf32, #tpu.memory_space<vmem>> -> memref<1x32xf32, #tpu.memory_space<vmem>>
    %107 = tpu.memref_slice %arg8[%104] : memref<8x!tpu.dma_semaphore, #tpu.memory_space<semaphore_mem>> -> memref<1x!tpu.dma_semaphore, #tpu.memory_space<semaphore_mem>>
    %108 = tpu.memref_squeeze %107 : memref<1x!tpu.dma_semaphore, #tpu.memory_space<semaphore_mem>> -> memref<!tpu.dma_semaphore, #tpu.memory_space<semaphore_mem>>
    tpu.wait_dma2 semaphore(%108 : memref<!tpu.dma_semaphore, #tpu.memory_space<semaphore_mem>>) src(%105 : memref<1x32xf32, #tpu.memory_space<any>>) dst(%106 : memref<1x32xf32, #tpu.memory_space<vmem>>)
    %c6_i32_69 = arith.constant 6 : i32
    %c1_i32_70 = arith.constant 1 : i32
    %109 = arith.muli %c6_i32_69, %c1_i32_70 : i32
    %c0_i32_71 = arith.constant 0 : i32
    %110 = arith.addi %c0_i32_71, %109 : i32
    %c0_i32_72 = arith.constant 0 : i32
    %c0_i32_73 = arith.constant 0 : i32
    %111 = tpu.memref_slice %arg2[%c0_i32_72, %c0_i32_73] : memref<64x32xf32, #tpu.memory_space<any>> -> memref<1x32xf32, #tpu.memory_space<any>>
    %c0_i32_74 = arith.constant 0 : i32
    %112 = tpu.memref_slice %arg7[%110, %c0_i32_74] : memref<8x32xf32, #tpu.memory_space<vmem>> -> memref<1x32xf32, #tpu.memory_space<vmem>>
    %113 = tpu.memref_slice %arg8[%110] : memref<8x!tpu.dma_semaphore, #tpu.memory_space<semaphore_mem>> -> memref<1x!tpu.dma_semaphore, #tpu.memory_space<semaphore_mem>>
    %114 = tpu.memref_squeeze %113 : memref<1x!tpu.dma_semaphore, #tpu.memory_space<semaphore_mem>> -> memref<!tpu.dma_semaphore, #tpu.memory_space<semaphore_mem>>
    tpu.wait_dma2 semaphore(%114 : memref<!tpu.dma_semaphore, #tpu.memory_space<semaphore_mem>>) src(%111 : memref<1x32xf32, #tpu.memory_space<any>>) dst(%112 : memref<1x32xf32, #tpu.memory_space<vmem>>)
    %c7_i32_75 = arith.constant 7 : i32
    %c1_i32_76 = arith.constant 1 : i32
    %115 = arith.muli %c7_i32_75, %c1_i32_76 : i32
    %c0_i32_77 = arith.constant 0 : i32
    %116 = arith.addi %c0_i32_77, %115 : i32
    %c0_i32_78 = arith.constant 0 : i32
    %c0_i32_79 = arith.constant 0 : i32
    %117 = tpu.memref_slice %arg2[%c0_i32_78, %c0_i32_79] : memref<64x32xf32, #tpu.memory_space<any>> -> memref<1x32xf32, #tpu.memory_space<any>>
    %c0_i32_80 = arith.constant 0 : i32
    %118 = tpu.memref_slice %arg7[%116, %c0_i32_80] : memref<8x32xf32, #tpu.memory_space<vmem>> -> memref<1x32xf32, #tpu.memory_space<vmem>>
    %119 = tpu.memref_slice %arg8[%116] : memref<8x!tpu.dma_semaphore, #tpu.memory_space<semaphore_mem>> -> memref<1x!tpu.dma_semaphore, #tpu.memory_space<semaphore_mem>>
    %120 = tpu.memref_squeeze %119 : memref<1x!tpu.dma_semaphore, #tpu.memory_space<semaphore_mem>> -> memref<!tpu.dma_semaphore, #tpu.memory_space<semaphore_mem>>
    tpu.wait_dma2 semaphore(%120 : memref<!tpu.dma_semaphore, #tpu.memory_space<semaphore_mem>>) src(%117 : memref<1x32xf32, #tpu.memory_space<any>>) dst(%118 : memref<1x32xf32, #tpu.memory_space<vmem>>)
    %c8_i32_81 = arith.constant 8 : i32
    %c0 = arith.constant 0 : index
    %c0_82 = arith.constant 0 : index
    %121 = vector.load %arg7[%c0, %c0_82] : memref<8x32xf32, #tpu.memory_space<vmem>>, vector<8x32xf32>
    %c0_83 = arith.constant 0 : index
    %c0_84 = arith.constant 0 : index
    %122 = vector.load %arg3[%c0_83, %c0_84] : memref<8x32xf32, #tpu.memory_space<vmem>>, vector<8x32xf32>
    %123 = arith.addf %121, %122 : vector<8x32xf32>
    %c0_85 = arith.constant 0 : index
    %c0_86 = arith.constant 0 : index
    %124 = vector.load %arg4[%c0_85, %c0_86] : memref<32x128xf32, #tpu.memory_space<vmem>>, vector<32x128xf32>
    %cst = arith.constant dense<0.000000e+00> : vector<8x128xf32>
    %125 = tpu.matmul %123, %124, %cst {dimension_numbers = #tpu.dot_dimension_numbers<[1], [0], [0], [1], [0, 0, 1, 1], [], []>} : vector<8x32xf32>, vector<32x128xf32>, vector<8x128xf32> -> vector<8x128xf32>
    %c0_87 = arith.constant 0 : index
    %c0_88 = arith.constant 0 : index
    %126 = vector.load %arg5[%c0_87, %c0_88] : memref<1x128xf32, #tpu.memory_space<vmem>>, vector<1x128xf32>
    %127 = vector.broadcast %126 : vector<1x128xf32> to vector<8x128xf32>
    %128 = arith.addf %125, %127 : vector<8x128xf32>
    %c0_89 = arith.constant 0 : index
    %c0_90 = arith.constant 0 : index
    %129 = vector.load %arg6[%c0_89, %c0_90] : memref<8x128xf32, #tpu.memory_space<vmem>>, vector<8x128xf32>
    tpu.vector_store %arg6[%c0_89, %c0_90], %128 {strides = array<i32>} : memref<8x128xf32, #tpu.memory_space<vmem>>, vector<8x128xf32>,
    return
  }
  func.func @transform_1(%arg0: i32, %arg1: memref<8xi32, #tpu.memory_space<smem>>) -> (i32, i32) {
    %c0_i32 = arith.constant 0 : i32
    %c0_i32_0 = arith.constant 0 : i32
    return %arg0, %c0_i32 : i32, i32
  }
  func.func @transform_2(%arg0: i32, %arg1: memref<8xi32, #tpu.memory_space<smem>>) -> (i32, i32) {
    %c0_i32 = arith.constant 0 : i32
    %c0_i32_0 = arith.constant 0 : i32
    %c0_i32_1 = arith.constant 0 : i32
    return %c0_i32, %c0_i32_0 : i32, i32
  }
  func.func @transform_3(%arg0: i32, %arg1: memref<8xi32, #tpu.memory_space<smem>>) -> (i32, i32) {
    %c0_i32 = arith.constant 0 : i32
    %c0_i32_0 = arith.constant 0 : i32
    %c0_i32_1 = arith.constant 0 : i32
    return %c0_i32, %c0_i32_0 : i32, i32
  }
  func.func @transform_4(%arg0: i32, %arg1: memref<8xi32, #tpu.memory_space<smem>>) -> (i32, i32) {
    %c0_i32 = arith.constant 0 : i32
    %c0_i32_0 = arith.constant 0 : i32
    return %arg0, %c0_i32 : i32, i32
  }
}

</mosaic_0001>

<bundles_post_ra>
// kernel: tpu_custom_call.1
= control target key start
LH: loop header
LB: loop body
LE: loop exit
PB: predicated region body
PF: predicated region fallthrough
CT: control target
= control target key end

     0   :  { %s873_s0 = inlined_call_operand.vmem [shape: s32[8], index: 0, kind: input, shape index: {}]   ;;  %s874_s1 = inlined_call_operand.vmem [shape: f32[64,32], index: 1, kind: input, shape index: {}]   ;;  %s875_s2 = inlined_call_operand.vmem [shape: f32[8,32], index: 2, kind: input, shape index: {}]   ;;  %s876_s3 = inlined_call_operand.vmem [shape: f32[32,128], index: 3, kind: input, shape index: {}]   ;;  %s877_s4 = inlined_call_operand.vmem [shape: f32[1,128], index: 4, kind: input, shape index: {}]   ;;  %s878_s5 = inlined_call_operand.hbm [shape: f32[8,128], index: 5, kind: output, shape index: {}]  }
   0x1   :  { %s10_s20 = sshll.u32 %s873_s0, 4  ;;  %s11_s20 = int_to_ptr.vmem [resolvable:$true] %s10_s20 }
   0x2   :  { %s727_s21 = scalar_lea.vmem %s11_s20, 16  ;;  %p732_p1 = scmp.lt.s32.totalorder %s11_s20, %s11_s20 }
   0x3   :  { %p728_p0 = scmp.ne.s32.totalorder %s11_s20, %s727_s21  ;;  %p733_p2 = scmp.lt.s32.totalorder %s727_s21, %s727_s21 }
   0x5   :  { %p734_p3 = por %p733_p2, %p732_p1 }
   0x7   :  { %p735_p4 = pnand %p734_p3, %p728_p0 }
   0x9   :  { %738 = shalt.err (!%p735_p4)  }
   0xa   :  { %s781_s22 = smov [#allocation5]  }
   0xb   :  { %13 = dma.vmem_to_smem %s11_s20, 16, %s781_s22, [#allocation4] }
   0xc   :  { %761 = dma.done.wait [#allocation4], 16 }
   0xd   :  { %762 = vsyncadd [#allocation4], 4294967280 }
   0xe   :  { %15 = sfence }
   0xf   :  { %16 = vsyncpa [#allocation7], 0  ;;  %s24_s23 = sld [smem:[#allocation5]] }
  0x15   :  { %s25_s26 = scalar_lea.vmem %s874_s1, %s24_s23 }
  0x16   :  { %v43_v0 = vld [vmem:[%s25_s26] sm:$0x1] }
  0x17   :  { %44 = vst [vmem:[#allocation2] sm:$0x1] %v43_v0 }
  0x18   :  { %69 = vsyncadd [#allocation3], 16  ;;  %s683_s0 = sld [smem:[#allocation5 + $0x1]] }
  0x1e   :  { %s72_s29 = scalar_lea.vmem %s874_s1, %s683_s0 }
  0x1f   :  { %v92_v1 = vld [vmem:[%s72_s29] sm:$0x1] }
  0x20   :  { %93 = vst [vmem:[#allocation2 + $0x1] sm:$0x1] %v92_v1 }
  0x21   :  { %118 = vsyncadd [#allocation3 + $0x1], 16  ;;  %s684_s30 = sld [smem:[#allocation5 + $0x2]] }
  0x27   :  { %s121_s8 = scalar_lea.vmem %s874_s1, %s684_s30 }
  0x28   :  { %v141_v2 = vld [vmem:[%s121_s8] sm:$0x1] }
  0x29   :  { %142 = vst [vmem:[#allocation2 + $0x2] sm:$0x1] %v141_v2 }
  0x2a   :  { %167 = vsyncadd [#allocation3 + $0x2], 16  ;;  %s685_s9 = sld [smem:[#allocation5 + $0x3]] }
  0x30   :  { %s170_s12 = scalar_lea.vmem %s874_s1, %s685_s9 }
  0x31   :  { %v190_v3 = vld [vmem:[%s170_s12] sm:$0x1] }
  0x32   :  { %191 = vst [vmem:[#allocation2 + $0x3] sm:$0x1] %v190_v3 }
  0x33   :  { %216 = vsyncadd [#allocation3 + $0x3], 16  ;;  %s686_s13 = sld [smem:[#allocation5 + $0x4]] }
  0x39   :  { %s219_s16 = scalar_lea.vmem %s874_s1, %s686_s13 }
  0x3a   :  { %v239_v4 = vld [vmem:[%s219_s16] sm:$0x1] }
  0x3b   :  { %240 = vst [vmem:[#allocation2 + $0x4] sm:$0x1] %v239_v4 }
  0x3c   :  { %265 = vsyncadd [#allocation3 + $0x4], 16  ;;  %s687_s17 = sld [smem:[#allocation5 + $0x5]] }
  0x42   :  { %s268_s20 = scalar_lea.vmem %s874_s1, %s687_s17 }
  0x43   :  { %v288_v5 = vld [vmem:[%s268_s20] sm:$0x1] }
  0x44   :  { %289 = vst [vmem:[#allocation2 + $0x5] sm:$0x1] %v288_v5 }
  0x45   :  { %314 = vsyncadd [#allocation3 + $0x5], 16  ;;  %s688_s21 = sld [smem:[#allocation5 + $0x6]] }
  0x4b   :  { %s317_s24 = scalar_lea.vmem %s874_s1, %s688_s21 }
  0x4c   :  { %v337_v6 = vld [vmem:[%s317_s24] sm:$0x1] }
  0x4d   :  { %338 = vst [vmem:[#allocation2 + $0x6] sm:$0x1] %v337_v6 }
  0x4e   :  { %363 = vsyncadd [#allocation3 + $0x6], 16  ;;  %s689_s25 = sld [smem:[#allocation5 + $0x7]] }
  0x54   :  { %s366_s27 = scalar_lea.vmem %s874_s1, %s689_s25 }
  0x55   :  { %v386_v7 = vld [vmem:[%s366_s27] sm:$0x1] }
  0x56   :  { %387 = vst [vmem:[#allocation2 + $0x7] sm:$0x1] %v386_v7 }
  0x57   :  { %412 = vsyncadd [#allocation3 + $0x7], 16 }
  0x58   :  { %763 = dma.done.wait [#allocation3], 16 }
  0x59   :  { %764 = vsyncadd [#allocation3], 4294967280 }
  0x5a   :  { %765 = dma.done.wait [#allocation3 + $0x1], 16 }
  0x5b   :  { %766 = vsyncadd [#allocation3 + $0x1], 4294967280 }
  0x5c   :  { %767 = dma.done.wait [#allocation3 + $0x2], 16 }
  0x5d   :  { %768 = vsyncadd [#allocation3 + $0x2], 4294967280 }
  0x5e   :  { %769 = dma.done.wait [#allocation3 + $0x3], 16 }
  0x5f   :  { %770 = vsyncadd [#allocation3 + $0x3], 4294967280 }
  0x60   :  { %771 = dma.done.wait [#allocation3 + $0x4], 16 }
  0x61   :  { %772 = vsyncadd [#allocation3 + $0x4], 4294967280 }
  0x62   :  { %773 = dma.done.wait [#allocation3 + $0x5], 16 }
  0x63   :  { %774 = vsyncadd [#allocation3 + $0x5], 4294967280 }
  0x64   :  { %775 = dma.done.wait [#allocation3 + $0x6], 16 }
  0x65   :  { %776 = vsyncadd [#allocation3 + $0x6], 4294967280 }
  0x66   :  { %777 = dma.done.wait [#allocation3 + $0x7], 16 }
  0x67   :  { %778 = vsyncadd [#allocation3 + $0x7], 4294967280  ;;  %v782_v8 = vmov 0.0|0.0   ;;  %vm783_vm0 = vmmov 0   ;;  %v784_v9 = vmov 0.0   ;;  %v433_v10 = vld [vmem:[%s876_s3] sm:$0xff] }
  0x68   :  { %716 = vmatprep.subr.bf16.mxu0 %v782_v8  ;;  %713 = vmatprep.mubr.msk.f32.mxu0 %vm783_vm0, %v784_v9  ;;  %v434_v11 = vld [vmem:[%s876_s3 + $0x8] sm:$0xff]  ;;  %v435_v12 = vld [vmem:[%s876_s3 + $0x10] sm:$0xff]  ;;  %v436_v14 = vld [vmem:[%s876_s3 + $0x18] sm:$0xff]  ;;  %vm444_vm1 = vcmask 261120   ;;  %s785_s14 = smov [#allocation6]  }
  0x69   :  { %v717_v13 = vpack.c.bf16 %v434_v11, %v433_v10  ;;  %v720_v15 = vpack.c.bf16 %v436_v14, %v435_v12  ;;  %v430_v16 = vld [vmem:[#allocation2] sm:$0xff]  ;;  %s525_s15 = sshll.u32 %s785_s14, 4  ;;  %s526_s15 = int_to_ptr.vmem [resolvable:$true] %s525_s15 }
  0x6a   :  { %v431_v17 = vld [vmem:[%s875_s2] sm:$0xff]  ;;  %s739_s3 = scalar_lea.vmem %s526_s15, 128  ;;  %p744_p6 = scmp.lt.s32.totalorder %s526_s15, %s526_s15 }
  0x6b   :  { %718 = vmatpush3.bf16.msra.mxu0 %v717_v13  ;;  %v432_v18 = vadd.f32 %v431_v17, %v430_v16  ;;  %v690_v19 = vld [vmem:[%s877_s4] ss:$0 sm:$0xff]  ;;  %p740_p5 = scmp.ne.s32.totalorder %s526_s15, %s739_s3  ;;  %p745_p7 = scmp.lt.s32.totalorder %s739_s3, %s739_s3 }
  0x6c   :  { %719 = vmatprep.subr.bf16.mxu0 %v782_v8 }
  0x6d   :  { %p746_p8 = por %p745_p7, %p744_p6 }
  0x6f   :  { %721 = vmatpush3.bf16.msra.mxu0 %v720_v15  ;;  %p747_p9 = pnand %p746_p8, %p740_p5 }
  0x72   :  { %714 = vmatmul.mubr.msk.f32.vlgmr.msra.gmra.mrb[0].mxu0 %vm444_vm1, %v432_v18 }
 0x145   :  { %v514_v20 = vpop.f32.mrb[0].mxu0 }
 0x146   :  { %v515_v21 = vadd.f32 %v690_v19, %v514_v20  ;;  %v715_v22 = vpop.f32.mrb[1].mxu0 }
 0x148   :  { %518 = vst [vmem:[#allocation6] sm:$0xff] %v515_v21 }
 0x149   :  { %750 = shalt.err (!%p747_p9)
}
 0x14a   :  { %s751_s17 = scalar_lea.hbm %s878_s5, 128 }
 0x14b   :  { %p752_p10 = scmp.ne.s32.totalorder %s878_s5, %s751_s17  ;;  %p755_p11 = scmp.lt.u32.totalorder %s751_s17, %s878_s5 }
 0x14d   :  { %p757_p12 = pnand %p755_p11, %p752_p10 }
 0x14f   :  { %760 = shalt.err (!%p757_p12)
}
 0x150   :  { %528 = dma.vmem_to_hbm [thread:$0]  %s526_s15, 128, %s878_s5, [#allocation7]  }
 0x151   :  { %779 = dma.done.wait [#allocation7], 128  }
 0x152   :  { %780 = vsyncadd [#allocation7], 4294967168 }
 0x153   :  { %532 = vsyncpa [#allocation7], 1 }
 0x154   :  { %533 = vsyncmov [#allocation3] }
 0x157   :  { %s534_s23 = vpop.sfrf %533 }
 0x158   :  { %p692_p13 = scmp.ne.s32.totalorder %s534_s23, 0 }
 0x15a   :  { %538 = shalt.err (%p692_p13)  }
 0x15b   :  { %540 = vsyncmov [#allocation3 + $0x1] }
 0x15e   :  { %s541_s24 = vpop.sfrf %540 }
 0x15f   :  { %p693_p0 = scmp.ne.s32.totalorder %s541_s24, 0 }
 0x161   :  { %545 = shalt.err (%p693_p0)  }
 0x162   :  { %547 = vsyncmov [#allocation3 + $0x2] }
 0x165   :  { %s548_s25 = vpop.sfrf %547 }
 0x166   :  { %p694_p1 = scmp.ne.s32.totalorder %s548_s25, 0 }
 0x168   :  { %552 = shalt.err (%p694_p1)  }
 0x169   :  { %554 = vsyncmov [#allocation3 + $0x3] }
 0x16c   :  { %s555_s26 = vpop.sfrf %554 }
 0x16d   :  { %p695_p2 = scmp.ne.s32.totalorder %s555_s26, 0 }
 0x16f   :  { %559 = shalt.err (%p695_p2)  }
 0x170   :  { %561 = vsyncmov [#allocation3 + $0x4] }
 0x173   :  { %s562_s5 = vpop.sfrf %561 }
 0x174   :  { %p696_p3 = scmp.ne.s32.totalorder %s562_s5, 0 }
 0x176   :  { %566 = shalt.err (%p696_p3)  }
 0x177   :  { %568 = vsyncmov [#allocation3 + $0x5] }
 0x17a   :  { %s569_s0 = vpop.sfrf %568 }
 0x17b   :  { %p697_p4 = scmp.ne.s32.totalorder %s569_s0, 0 }
 0x17d   :  { %573 = shalt.err (%p697_p4)  }
 0x17e   :  { %575 = vsyncmov [#allocation3 + $0x6] }
 0x181   :  { %s576_s27 = vpop.sfrf %575 }
 0x182   :  { %p698_p5 = scmp.ne.s32.totalorder %s576_s27, 0 }
 0x184   :  { %580 = shalt.err (%p698_p5)  }
 0x185   :  { %582 = vsyncmov [#allocation3 + $0x7] }
 0x188   :  { %s583_s1 = vpop.sfrf %582 }
 0x189   :  { %p699_p6 = scmp.ne.s32.totalorder %s583_s1, 0 }
 0x18b   :  { %587 = shalt.err (%p699_p6)  }

</bundles_post_ra>
